<compile_context>
chip_gen: v7x
topology: tpu7x:2x2x1
jax: 0.10.0
libtpu: 0.0.40
codegen_flags: <defaults>
</compile_context>

<pallas_src>
import jax
import jax.numpy as jnp
from jax.experimental import pallas as pl
from jax.experimental.pallas import tpu as pltpu


def _round_up(x, m):
    return ((x + m - 1) // m) * m


def _disc_kernel(xT_ref, w1t_ref, w2_ref, b2_ref, o_ref):
    # xT_ref : (K_PAD, TILE_B)  -- [s | a | 1 | 0...]^T, batch on lanes
    # w1t    : (H, K_PAD)       -- [W1^T | b1 | 0...]   (fc1 bias folded into a column)
    # w2     : (1, H)           -- fc2 weight row
    # b2     : (1,)             -- scalar in SMEM
    # o_ref  : (1, TILE_B)      -- lane-dense output block
    hT = jnp.dot(w1t_ref[...], xT_ref[...],
                 preferred_element_type=jnp.float32,
                 precision=jax.lax.Precision.HIGHEST)        # (H, TILE_B), MXU K=K_PAD
    hT = jnp.maximum(hT, 0.0)                                # ReLU (bias already in matmul)
    logit = jnp.dot(w2_ref[...], hT,
                    preferred_element_type=jnp.float32,
                    precision=jax.lax.Precision.HIGHEST)     # (1, TILE_B), MXU K=H
    o_ref[...] = jax.nn.sigmoid(logit + b2_ref[0])           # lane-dense unmasked store


def discriminator_forward(s, a, w1t_aug, w2_row, b2, *, max_tile_b=2048):
    """sigmoid(relu([s, a] @ W1 + b1) @ w2 + b2), batch transposed onto the lane axis.

    w1t_aug : (hidden, k_pad) = [W1^T | b1 | zeros],  w2_row : (1, hidden),  b2 : (1,).
    """
    s = s.astype(jnp.float32)
    a = a.astype(jnp.float32)
    batch, state_dim = s.shape
    action_dim = a.shape[1]
    in_dim = state_dim + action_dim
    hidden, k_pad = w1t_aug.shape
    assert k_pad >= in_dim + 1 and k_pad % 8 == 0, "w1t_aug must be K-padded with a bias column"

    # Batch tiling: pad only to the next multiple of 128 lanes, then split into an
    # even number of >=128-wide tiles (v7x: both TensorCores busy; v5e/v6e: no cost).
    padded128 = _round_up(max(batch, 1), 128)
    num_tiles = pl.cdiv(padded128, max(128, _round_up(max_tile_b, 128)))
    if num_tiles > 1 and num_tiles % 2 == 1:
        num_tiles += 1
    tile_b = _round_up(pl.cdiv(padded128, num_tiles), 128)
    padded_b = tile_b * num_tiles

    # Fused concat + K-pad + bias(ones row) + batch-pad + transpose: one small copy.
    xT = jnp.zeros((k_pad, padded_b), jnp.float32)
    xT = xT.at[:in_dim, :batch].set(jnp.concatenate([s, a], axis=1).T)
    xT = xT.at[in_dim, :].set(1.0)          # ones row -> fc1 bias comes out of the matmul

    cost = pl.CostEstimate(
        flops=2 * padded_b * hidden * (k_pad + 1),
        transcendentals=padded_b,
        bytes_accessed=4 * (k_pad * padded_b + hidden * k_pad + hidden + 1 + padded_b),
    )

    out = pl.pallas_call(
        _disc_kernel,
        out_shape=jax.ShapeDtypeStruct((1, padded_b), jnp.float32),
        grid=(num_tiles,),
        in_specs=[
            pl.BlockSpec((k_pad, tile_b), lambda i: (0, i)),      # x^T tile (lane-dense)
            pl.BlockSpec((hidden, k_pad), lambda i: (0, 0)),      # W1_aug^T (VMEM-resident)
            pl.BlockSpec((1, hidden), lambda i: (0, 0)),          # w2 row   (VMEM-resident)
            pl.BlockSpec(memory_space=pltpu.MemorySpace.SMEM),    # b2 scalar
        ],
        out_specs=pl.BlockSpec((1, tile_b), lambda i: (0, i)),    # lane-dense output row
        compiler_params=pltpu.CompilerParams(
            dimension_semantics=("parallel",)),                   # 2-TC split on v7x
        cost_estimate=cost,
    )(xT, w1t_aug, w2_row, b2)

    # Single slice of the lane-dense row back to (batch, 1).
    return out[0, :batch][:, None]


def init_discriminator_params(key, state_dim, action_dim, hidden_dim):
    """PyTorch-style Linear init; packs fc1 as [W1^T | b1 | 0] for the kernel layout."""
    in_dim = state_dim + action_dim
    k_pad = _round_up(in_dim + 1, 8)          # +1 column carries the fc1 bias
    k1, k2, k3, k4 = jax.random.split(key, 4)
    bound1 = 1.0 / (in_dim ** 0.5)
    bound2 = 1.0 / (hidden_dim ** 0.5)
    w1 = jax.random.uniform(k1, (in_dim, hidden_dim), jnp.float32, -bound1, bound1)
    b1 = jax.random.uniform(k2, (hidden_dim,), jnp.float32, -bound1, bound1)
    w2 = jax.random.uniform(k3, (hidden_dim,), jnp.float32, -bound2, bound2)
    b2 = jax.random.uniform(k4, (1,), jnp.float32, -bound2, bound2)
    w1t_aug = jnp.zeros((hidden_dim, k_pad), jnp.float32)
    w1t_aug = w1t_aug.at[:, :in_dim].set(w1.T)
    w1t_aug = w1t_aug.at[:, in_dim].set(b1)
    return w1t_aug, w2[None, :], b2


def reference_forward(s, a, w1t_aug, w2_row, b2):
    """Pure-JAX reference matching the PyTorch module semantics."""
    in_dim = s.shape[1] + a.shape[1]
    w1 = w1t_aug[:, :in_dim].T               # (in_dim, hidden)
    b1 = w1t_aug[:, in_dim]                  # (hidden,)
    x = jnp.concatenate([s, a], axis=1)
    h = jax.nn.relu(jnp.dot(x, w1, precision=jax.lax.Precision.HIGHEST) + b1)
    logit = jnp.dot(h, w2_row[0], precision=jax.lax.Precision.HIGHEST) + b2[0]
    return jax.nn.sigmoid(logit)[:, None]


if __name__ == "__main__":
    # CartPole-v1: state_dim=4, action_dim=2, hidden_dim=128 (as in the module).
    state_dim, action_dim, hidden_dim = 4, 2, 128

    key = jax.random.PRNGKey(0)
    k_s, k_a, k_p, k_s2, k_a2 = jax.random.split(key, 5)
    params = init_discriminator_params(k_p, state_dim, action_dim, hidden_dim)

    # Small batch (8): single 128-lane tile, grid=(1,).
    batch = 8
    s = jax.random.normal(k_s, (batch, state_dim), dtype=jnp.float32)
    act_idx = jax.random.randint(k_a, (batch,), 0, action_dim)
    a = jax.nn.one_hot(act_idx, action_dim, dtype=jnp.float32)   # one-hot actions (GAIL)

    out = jax.block_until_ready(discriminator_forward(s, a, *params))
    ref = reference_forward(s, a, *params)
    assert out.shape == (batch, 1)
    assert jnp.allclose(out, ref, atol=1e-5), "mismatch vs reference (small batch)"

    # Larger, non-multiple batch: exercises the fused pad/transpose copy and a
    # multi-tile grid with an even tile count (v7x dual-TC path).
    batch2 = 300
    s2 = jax.random.normal(k_s2, (batch2, state_dim), dtype=jnp.float32)
    a2 = jax.nn.one_hot(jax.random.randint(k_a2, (batch2,), 0, action_dim),
                        action_dim, dtype=jnp.float32)
    out2 = jax.block_until_ready(discriminator_forward(s2, a2, *params, max_tile_b=128))
    ref2 = reference_forward(s2, a2, *params)
    assert out2.shape == (batch2, 1)
    assert jnp.allclose(out2, ref2, atol=1e-5), "mismatch vs reference (tiled batch)"

    print("KERNEL_OK")
</pallas_src>

<mosaic_0001>
module attributes {stable_mosaic.version = 11 : i64} {
  func.func @_disc_kernel(%arg0: i32, %arg1: memref<8x128xf32, #tpu.memory_space<vmem>>, %arg2: memref<128x8xf32, #tpu.memory_space<vmem>>, %arg3: memref<1x128xf32, #tpu.memory_space<vmem>>, %arg4: memref<1xf32, #tpu.memory_space<smem>>, %arg5: memref<1x128xf32, #tpu.memory_space<vmem>>) attributes {dimension_semantics = [#tpu.dimension_semantics<parallel>], iteration_bounds = array<i64: 1>, scalar_prefetch = 0 : i64, scratch_operands = 0 : i64, tpu.core_type = #tpu.core_type<tc>, window_params = [{transform_indices = @transform_0, window_bounds = array<i64: 8, 128>}, {pipeline_mode = #tpu.pipeline_mode<synchronous>, transform_indices = @transform_1, window_bounds = array<i64: 128, 8>}, {pipeline_mode = #tpu.pipeline_mode<synchronous>, transform_indices = @transform_2, window_bounds = array<i64: 1, 128>}, {transform_indices = @transform_3, window_bounds = array<i64: 1>}, {transform_indices = @transform_4, window_bounds = array<i64: 1, 128>}]} {
    %c0 = arith.constant 0 : index
    %c0_0 = arith.constant 0 : index
    %0 = vector.load %arg2[%c0, %c0_0] : memref<128x8xf32, #tpu.memory_space<vmem>>, vector<128x8xf32>
    %c0_1 = arith.constant 0 : index
    %c0_2 = arith.constant 0 : index
    %1 = vector.load %arg1[%c0_1, %c0_2] : memref<8x128xf32, #tpu.memory_space<vmem>>, vector<8x128xf32>
    %cst = arith.constant dense<0.000000e+00> : vector<128x128xf32>
    %2 = tpu.matmul %0, %1, %cst {dimension_numbers = #tpu.dot_dimension_numbers<[1], [0], [0], [1], [0, 0, 1, 1], [], []>, precision = #tpu.contract_precision<fp32>} : vector<128x8xf32>, vector<8x128xf32>, vector<128x128xf32> -> vector<128x128xf32>
    %cst_3 = arith.constant 0.000000e+00 : f32
    %3 = vector.broadcast %cst_3 : f32 to vector<128x128xf32>
    %4 = arith.maximumf %2, %3 : vector<128x128xf32>
    %c0_4 = arith.constant 0 : index
    %c0_5 = arith.constant 0 : index
    %5 = vector.load %arg3[%c0_4, %c0_5] : memref<1x128xf32, #tpu.memory_space<vmem>>, vector<1x128xf32>
    %cst_6 = arith.constant dense<0.000000e+00> : vector<1x128xf32>
    %6 = tpu.matmul %5, %4, %cst_6 {dimension_numbers = #tpu.dot_dimension_numbers<[1], [0], [0], [1], [0, 0, 1, 1], [], []>, precision = #tpu.contract_precision<fp32>} : vector<1x128xf32>, vector<128x128xf32>, vector<1x128xf32> -> vector<1x128xf32>
    %c0_7 = arith.constant 0 : index
    %7 = memref.load %arg4[%c0_7] : memref<1xf32, #tpu.memory_space<smem>>
    %8 = vector.broadcast %7 : f32 to vector<1x128xf32>
    %9 = arith.addf %6, %8 : vector<1x128xf32>
    %10 = arith.negf %9 : vector<1x128xf32>
    %11 = math.exp %10 : vector<1x128xf32>
    %cst_8 = arith.constant 1.000000e+00 : f32
    %12 = vector.broadcast %cst_8 : f32 to vector<1x128xf32>
    %13 = arith.addf %12, %11 : vector<1x128xf32>
    %14 = arith.divf %12, %13 : vector<1x128xf32>
    %c0_9 = arith.constant 0 : index
    %c0_10 = arith.constant 0 : index
    %15 = vector.load %arg5[%c0_9, %c0_10] : memref<1x128xf32, #tpu.memory_space<vmem>>, vector<1x128xf32>
    tpu.vector_store %arg5[%c0_9, %c0_10], %14 {strides = array<i32>} : memref<1x128xf32, #tpu.memory_space<vmem>>, vector<1x128xf32>,
    return
  }
  func.func @transform_0(%arg0: i32) -> (i32, i32) {
    %c0_i32 = arith.constant 0 : i32
    %c0_i32_0 = arith.constant 0 : i32
    return %c0_i32, %arg0 : i32, i32
  }
  func.func @transform_1(%arg0: i32) -> (i32, i32) {
    %c0_i32 = arith.constant 0 : i32
    %c0_i32_0 = arith.constant 0 : i32
    %c0_i32_1 = arith.constant 0 : i32
    return %c0_i32, %c0_i32_0 : i32, i32
  }
  func.func @transform_2(%arg0: i32) -> (i32, i32) {
    %c0_i32 = arith.constant 0 : i32
    %c0_i32_0 = arith.constant 0 : i32
    %c0_i32_1 = arith.constant 0 : i32
    return %c0_i32, %c0_i32_0 : i32, i32
  }
  func.func @transform_3(%arg0: i32) -> i32 {
    %c0_i32 = arith.constant 0 : i32
    %c0_i32_0 = arith.constant 0 : i32
    return %c0_i32 : i32
  }
  func.func @transform_4(%arg0: i32) -> (i32, i32) {
    %c0_i32 = arith.constant 0 : i32
    %c0_i32_0 = arith.constant 0 : i32
    return %c0_i32, %arg0 : i32, i32
  }
}

</mosaic_0001>

<bundles_post_ra>
// kernel: tpu_custom_call.1
= control target key start
LH: loop header
LB: loop body
LE: loop exit
PB: predicated region body
PF: predicated region fallthrough
CT: control target
= control target key end

     0   :  { %vm36_vm0 = vcmask 64512   ;;  %s3308_s0 = inlined_call_operand.vmem [shape: f32[8,128], index: 0, kind: input, shape index: {}]   ;;  %s3309_s1 = inlined_call_operand.vmem [shape: f32[128,8], index: 1, kind: input, shape index: {}]   ;;  %s3310_s2 = inlined_call_operand.vmem [shape: f32[1,128], index: 2, kind: input, shape index: {}]   ;;  %s3311_s3 = inlined_call_operand.<no memory space> [shape: f32[1], index: 3, kind: input, shape index: {}]   ;;  %s3312_s4 = inlined_call_operand.hbm [shape: f32[1,128], index: 4, kind: output, shape index: {}]  }
   0x1   :  { %v35_v0 = vld [vmem:[%s3308_s0] sm:$0xff]  ;;  %v20_v2 = vld [vmem:[%s3309_s1 + $0x8] sm:$0xff]  ;;  %v21_v6 = vld [vmem:[%s3309_s1 + $0x10] sm:$0xff] }
   0x2   :  { %v19_v1 = vld [vmem:[%s3309_s1] sm:$0xff]  ;;  %v2733_v3 = vand.u32 4294901760, %v35_v0  ;;  %v41_v5 = vsel %vm36_vm0, %v20_v2, 0  ;;  %v22_v7 = vld [vmem:[%s3309_s1 + $0x18] sm:$0xff]  ;;  %v44_v11 = vsel %vm36_vm0, %v21_v6, 0  ;;  %v24_v13 = vld [vmem:[%s3309_s1 + $0x28] sm:$0xff] }
   0x3   :  { %v38_v4 = vsel %vm36_vm0, %v19_v1, 0  ;;  %v23_v8 = vld [vmem:[%s3309_s1 + $0x20] sm:$0xff]  ;;  %v2748_v10 = vand.u32 4294901760, %v41_v5  ;;  %v47_v12 = vsel %vm36_vm0, %v22_v7, 0  ;;  %v2759_v15 = vand.u32 4294901760, %v44_v11  ;;  %v25_v18 = vld [vmem:[%s3309_s1 + $0x30] sm:$0xff] }
   0x4   :  { %v2746_v9 = vand.u32 4294901760, %v38_v4  ;;  %2062 = vmatprep.subr.mxu0 %v2733_v3  ;;  %v2757_v14 = vsub.f32 %v35_v0, %v2733_v3  ;;  %v2761_v16 = vand.u32 4294901760, %v47_v12  ;;  %v50_v17 = vsel %vm36_vm0, %v23_v8, 0 }
   0x5   :  { %2063 = vmatpush3.msra.mxu0 %v2733_v3  ;;  %v2772_v20 = vsub.f32 %v41_v5, %v2748_v10  ;;  %v2774_v21 = vand.u32 4294901760, %v50_v17  ;;  %v53_v22 = vsel %vm36_vm0, %v24_v13, 0  ;;  %v2781_v24 = vsub.f32 %v44_v11, %v2759_v15 }
   0x6   :  { %v2769_v19 = vsub.f32 %v38_v4, %v2746_v9  ;;  %v2778_v23 = vand.u32 4294901760, %v2757_v14  ;;  %v2784_v25 = vsub.f32 %v47_v12, %v2761_v16  ;;  %v2786_v26 = vand.u32 4294901760, %v53_v22 }
   0x7   :  { %v163_v28 = vand.u32 4294901760, %v2772_v20  ;;  %v2791_v29 = vsub.f32 %v50_v17, %v2774_v21  ;;  %v56_v30 = vsel %vm36_vm0, %v25_v18, 0 }
   0x8   :  { %v153_v27 = vand.u32 4294901760, %v2769_v19 }
   0x9   :  { %10 = vsyncpa [#allocation4], 0  ;;  %v315_v31 = vsub.f32 %v2757_v14, %v2778_v23  ;;  %v173_v32 = vand.u32 4294901760, %v2781_v24  ;;  %v183_v33 = vand.u32 4294901760, %v2784_v25  ;;  %v2799_v34 = vsub.f32 %v53_v22, %v2786_v26  ;;  %v26_v39 = vld [vmem:[%s3309_s1 + $0x38] sm:$0xff]  ;;  %v27_v44 = vld [vmem:[%s3309_s1 + $0x40] sm:$0xff] }
   0xa   :  { %v154_v35 = vsub.f32 %v2769_v19, %v153_v27  ;;  %v164_v36 = vsub.f32 %v2772_v20, %v163_v28  ;;  %v193_v37 = vand.u32 4294901760, %v2791_v29  ;;  %v2808_v38 = vand.u32 4294901760, %v56_v30  ;;  %v28_v49 = vld [vmem:[%s3309_s1 + $0x48] sm:$0xff]  ;;  %v29_v50 = vld [vmem:[%s3309_s1 + $0x50] sm:$0xff]  ;;  %v30_v55 = vld [vmem:[%s3309_s1 + $0x58] sm:$0xff]  ;;  %s2698_s23 = smov [#allocation3]  }
   0xb   :  { %v316_v40 = vand.u32 4294901760, %v315_v31  ;;  %v174_v41 = vsub.f32 %v2781_v24, %v173_v32  ;;  %v184_v42 = vsub.f32 %v2784_v25, %v183_v33  ;;  %v203_v43 = vand.u32 4294901760, %v2799_v34  ;;  %v31_v60 = vld [vmem:[%s3309_s1 + $0x60] sm:$0xff]  ;;  %v32_v61 = vld [vmem:[%s3309_s1 + $0x68] sm:$0xff]  ;;  %v33_v13 = vld [vmem:[%s3309_s1 + $0x70] sm:$0xff]  ;;  %s1849_s24 = sshll.u32 %s2698_s23, 4  ;;  %s1850_s24 = int_to_ptr.vmem [resolvable:$true] %s1849_s24 }
   0xc   :  { %v155_v45 = vand.u32 4294901760, %v154_v35  ;;  %v165_v46 = vand.u32 4294901760, %v164_v36  ;;  %v194_v47 = vsub.f32 %v2791_v29, %v193_v37  ;;  %v2827_v48 = vsub.f32 %v56_v30, %v2808_v38  ;;  %s2671_s25 = scalar_lea.vmem %s1850_s24, 16  ;;  %s2675_s26 = scalar_lea.vmem %s1850_s24, 32 }
   0xd   :  { %2088 = vmatprep.subr.mxu0 %v316_v40  ;;  %v175_v51 = vand.u32 4294901760, %v174_v41  ;;  %v185_v52 = vand.u32 4294901760, %v184_v42  ;;  %v204_v53 = vsub.f32 %v2799_v34, %v203_v43  ;;  %v59_v54 = vsel %vm36_vm0, %v26_v39, 0  ;;  %p2672_p0 = scmp.ne.s32.totalorder %s1850_s24, %s2671_s25  ;;  %p2676_p1 = scmp.lt.s32.totalorder %s1850_s24, %s1850_s24 }
   0xe   :  { %2064 = vmatprep.mubr.f32.mxu0 %v155_v45  ;;  %v195_v56 = vand.u32 4294901760, %v194_v47  ;;  %v213_v57 = vand.u32 4294901760, %v2827_v48  ;;  %v2843_v58 = vand.u32 4294901760, %v59_v54  ;;  %v62_v59 = vsel %vm36_vm0, %v27_v44, 0  ;;  %p2677_p2 = scmp.lt.s32.totalorder %s2675_s26, %s2671_s25 }
   0xf   :  { %2065 = vmatmul.mubr.f32.vlgmr.msra.gmra.mrb[0].mxu0 %v165_v46  ;;  %v205_v62 = vand.u32 4294901760, %v204_v53  ;;  %v2852_v63 = vand.u32 4294901760, %v62_v59  ;;  %v65_v0 = vsel %vm36_vm0, %v28_v49, 0  ;;  %v68_v1 = vsel %vm36_vm0, %v29_v50, 0  ;;  %v34_v49 = vld [vmem:[%s3309_s1 + $0x78] sm:$0xff] }
  0x10   :  { %2089 = vmatpush3.msra.mxu0 %v316_v40  ;;  %2067 = vmatprep.mubr.f32.mxu0 %v175_v51  ;;  %v214_v2 = vsub.f32 %v2827_v48, %v213_v57  ;;  %v2860_v4 = vsub.f32 %v59_v54, %v2843_v58  ;;  %v2862_v5 = vand.u32 4294901760, %v65_v0  ;;  %v2864_v6 = vand.u32 4294901760, %v68_v1  ;;  %p2678_p3 = por %p2677_p2, %p2676_p1 }
  0x11   :  { %v2867_v7 = vsub.f32 %v62_v59, %v2852_v63  ;;  %v71_v8 = vsel %vm36_vm0, %v30_v55, 0  ;;  %v74_v11 = vsel %vm36_vm0, %v31_v60, 0  ;;  %v77_v12 = vsel %vm36_vm0, %v32_v61, 0  ;;  %2114 = vmatprep.subr.mxu0 %v2757_v14 }
  0x12   :  { %v215_v17 = vand.u32 4294901760, %v214_v2  ;;  %v223_v18 = vand.u32 4294901760, %v2860_v4  ;;  %v2878_v22 = vsub.f32 %v65_v0, %v2862_v5  ;;  %v2881_v30 = vsub.f32 %v68_v1, %v2864_v6  ;;  %p2679_p4 = pnand %p2678_p3, %p2672_p0 }
  0x13   :  { %2068 = vmatmul.mubr.f32.gmra.mrb[2].mxu0 %v185_v52  ;;  %v233_v31 = vand.u32 4294901760, %v2867_v7  ;;  %v2884_v35 = vand.u32 4294901760, %v71_v8  ;;  %v2886_v36 = vand.u32 4294901760, %v74_v11  ;;  %v2888_v39 = vand.u32 4294901760, %v77_v12 }
  0x14   :  { %2070 = vmatprep.mubr.f32.mxu0 %v195_v56  ;;  %v224_v40 = vsub.f32 %v2860_v4, %v223_v18  ;;  %v243_v41 = vand.u32 4294901760, %v2878_v22  ;;  %v253_v42 = vand.u32 4294901760, %v2881_v30  ;;  %v80_v44 = vsel %vm36_vm0, %v33_v13, 0 }
  0x15   :  { %v234_v45 = vsub.f32 %v2867_v7, %v233_v31  ;;  %v2900_v46 = vsub.f32 %v71_v8, %v2884_v35  ;;  %v2903_v47 = vsub.f32 %v74_v11, %v2886_v36  ;;  %v2909_v50 = vsub.f32 %v77_v12, %v2888_v39 }
  0x16   :  { %v2911_v51 = vand.u32 4294901760, %v80_v44  ;;  %v225_v52 = vand.u32 4294901760, %v224_v40  ;;  %v244_v53 = vsub.f32 %v2878_v22, %v243_v41  ;;  %v254_v54 = vsub.f32 %v2881_v30, %v253_v42 }
  0x17   :  { %2071 = vmatmul.mubr.f32.gmra.mrb[4].mxu0 %v205_v62  ;;  %v263_v55 = vand.u32 4294901760, %v2900_v46  ;;  %v235_v56 = vand.u32 4294901760, %v234_v45  ;;  %v273_v59 = vand.u32 4294901760, %v2903_v47  ;;  %v83_v61 = vsel %vm36_vm0, %v34_v49, 0 }
  0x18   :  { %2073 = vmatprep.mubr.f32.mxu0 %v215_v17  ;;  %v2922_v60 = vsub.f32 %v80_v44, %v2911_v51  ;;  %v2925_v62 = vand.u32 4294901760, %v83_v61  ;;  %v245_v0 = vand.u32 4294901760, %v244_v53  ;;  %v283_v2 = vand.u32 4294901760, %v2909_v50 }
  0x19   :  { %v264_v1 = vsub.f32 %v2900_v46, %v263_v55  ;;  %v255_v11 = vand.u32 4294901760, %v254_v54  ;;  %v274_v12 = vsub.f32 %v2903_v47, %v273_v59  ;;  %vm2696_vm1 = vmmov 0  }
  0x1a   :  { %v2932_v8 = vsub.f32 %v83_v61, %v2925_v62  ;;  %v293_v13 = vand.u32 4294901760, %v2922_v60  ;;  %v284_v40 = vsub.f32 %v2909_v50, %v283_v2 }
  0x1b   :  { %2074 = vmatmul.mubr.f32.gmra.mrb[6].mxu0 %v225_v52  ;;  %v265_v17 = vand.u32 4294901760, %v264_v1  ;;  %v275_v45 = vand.u32 4294901760, %v274_v12 }
  0x1c   :  { %2076 = vmatprep.mubr.f32.mxu0 %v235_v56  ;;  %v303_v44 = vand.u32 4294901760, %v2932_v8  ;;  %v294_v49 = vsub.f32 %v2922_v60, %v293_v13  ;;  %v285_v52 = vand.u32 4294901760, %v284_v40 }
  0x1e   :  { %v304_v53 = vsub.f32 %v2932_v8, %v303_v44  ;;  %v295_v54 = vand.u32 4294901760, %v294_v49 }
  0x1f   :  { %2077 = vmatmul.mubr.f32.gmra.mrb[8].mxu0 %v245_v0 }
  0x20   :  { %2079 = vmatprep.mubr.f32.mxu0 %v255_v11  ;;  %v305_v56 = vand.u32 4294901760, %v304_v53 }
  0x23   :  { %2080 = vmatmul.mubr.f32.gmra.mrb[10].mxu0 %v265_v17 }
  0x24   :  { %2082 = vmatprep.mubr.f32.mxu0 %v275_v45 }
  0x27   :  { %2083 = vmatmul.mubr.f32.gmra.mrb[12].mxu0 %v285_v52 }
  0x28   :  { %2085 = vmatprep.mubr.f32.mxu0 %v295_v54 }
  0x2b   :  { %2086 = vmatmul.mubr.f32.gmra.mrb[14].mxu0 %v305_v56 }
  0x2c   :  { %2090 = vmatprep.mubr.f32.mxu0 %v2746_v9 }
  0x2f   :  { %2091 = vmatmul.mubr.f32.vlgmr.msra.gmra.mrb[0].mxu0 %v2748_v10 }
  0x30   :  { %2115 = vmatpush3.msra.mxu0 %v2757_v14  ;;  %2093 = vmatprep.mubr.f32.mxu0 %v2759_v15 }
  0x31   :  { %2140 = vmatprep.subr.mxu0 %v2733_v3 }
  0x33   :  { %2094 = vmatmul.mubr.f32.gmra.mrb[2].mxu0 %v2761_v16 }
  0x34   :  { %2096 = vmatprep.mubr.f32.mxu0 %v2774_v21 }
  0x37   :  { %2097 = vmatmul.mubr.f32.gmra.mrb[4].mxu0 %v2786_v26 }
  0x38   :  { %2099 = vmatprep.mubr.f32.mxu0 %v2808_v38 }
  0x3b   :  { %2100 = vmatmul.mubr.f32.gmra.mrb[6].mxu0 %v2843_v58 }
  0x3c   :  { %2102 = vmatprep.mubr.f32.mxu0 %v2852_v63 }
  0x3f   :  { %2103 = vmatmul.mubr.f32.gmra.mrb[8].mxu0 %v2862_v5 }
  0x40   :  { %2105 = vmatprep.mubr.f32.mxu0 %v2864_v6 }
  0x43   :  { %2106 = vmatmul.mubr.f32.gmra.mrb[10].mxu0 %v2884_v35 }
  0x44   :  { %2108 = vmatprep.mubr.f32.mxu0 %v2886_v36 }
  0x47   :  { %2109 = vmatmul.mubr.f32.gmra.mrb[12].mxu0 %v2888_v39 }
  0x48   :  { %2111 = vmatprep.mubr.f32.mxu0 %v2911_v51 }
  0x4b   :  { %2112 = vmatmul.mubr.f32.gmra.mrb[14].mxu0 %v2925_v62 }
  0x4c   :  { %2116 = vmatprep.mubr.f32.mxu0 %v2769_v19 }
  0x4f   :  { %2117 = vmatmul.mubr.f32.vlgmr.msra.gmra.mrb[0].mxu0 %v2772_v20 }
  0x50   :  { %2141 = vmatpush3.msra.mxu0 %v2733_v3  ;;  %2119 = vmatprep.mubr.f32.mxu0 %v2781_v24 }
  0x51   :  { %2166 = vmatprep.subr.mxu0 %v2778_v23 }
  0x53   :  { %2120 = vmatmul.mubr.f32.gmra.mrb[2].mxu0 %v2784_v25 }
  0x54   :  { %2122 = vmatprep.mubr.f32.mxu0 %v2791_v29 }
  0x57   :  { %2123 = vmatmul.mubr.f32.gmra.mrb[4].mxu0 %v2799_v34 }
  0x58   :  { %2125 = vmatprep.mubr.f32.mxu0 %v2827_v48 }
  0x5b   :  { %2126 = vmatmul.mubr.f32.gmra.mrb[6].mxu0 %v2860_v4 }
  0x5c   :  { %2128 = vmatprep.mubr.f32.mxu0 %v2867_v7 }
  0x5f   :  { %2129 = vmatmul.mubr.f32.gmra.mrb[8].mxu0 %v2878_v22 }
  0x60   :  { %2131 = vmatprep.mubr.f32.mxu0 %v2881_v30 }
  0x63   :  { %2132 = vmatmul.mubr.f32.gmra.mrb[10].mxu0 %v2900_v46 }
  0x64   :  { %2134 = vmatprep.mubr.f32.mxu0 %v2903_v47 }
  0x67   :  { %2135 = vmatmul.mubr.f32.gmra.mrb[12].mxu0 %v2909_v50 }
  0x68   :  { %2137 = vmatprep.mubr.f32.mxu0 %v2922_v60 }
  0x6b   :  { %2138 = vmatmul.mubr.f32.gmra.mrb[14].mxu0 %v2932_v8 }
  0x6c   :  { %2142 = vmatprep.mubr.f32.mxu0 %v153_v27 }
  0x6f   :  { %2143 = vmatmul.mubr.f32.vlgmr.msra.gmra.mrb[0].mxu0 %v163_v28 }
  0x70   :  { %2167 = vmatpush3.msra.mxu0 %v2778_v23  ;;  %2145 = vmatprep.mubr.f32.mxu0 %v173_v32 }
  0x71   :  { %2192 = vmatprep.subr.mxu0 %v2733_v3 }
  0x73   :  { %2146 = vmatmul.mubr.f32.gmra.mrb[2].mxu0 %v183_v33 }
  0x74   :  { %2148 = vmatprep.mubr.f32.mxu0 %v193_v37 }
  0x77   :  { %2149 = vmatmul.mubr.f32.gmra.mrb[4].mxu0 %v203_v43 }
  0x78   :  { %2151 = vmatprep.mubr.f32.mxu0 %v213_v57 }
  0x7b   :  { %2152 = vmatmul.mubr.f32.gmra.mrb[6].mxu0 %v223_v18 }
  0x7c   :  { %2154 = vmatprep.mubr.f32.mxu0 %v233_v31 }
  0x7f   :  { %2155 = vmatmul.mubr.f32.gmra.mrb[8].mxu0 %v243_v41 }
  0x80   :  { %2157 = vmatprep.mubr.f32.mxu0 %v253_v42 }
  0x83   :  { %2158 = vmatmul.mubr.f32.gmra.mrb[10].mxu0 %v263_v55 }
  0x84   :  { %2160 = vmatprep.mubr.f32.mxu0 %v273_v59 }
  0x87   :  { %2161 = vmatmul.mubr.f32.gmra.mrb[12].mxu0 %v283_v2 }
  0x88   :  { %2163 = vmatprep.mubr.f32.mxu0 %v293_v13 }
  0x8b   :  { %2164 = vmatmul.mubr.f32.gmra.mrb[14].mxu0 %v303_v44 }
  0x8c   :  { %2168 = vmatprep.mubr.f32.mxu0 %v2746_v9 }
  0x8f   :  { %2169 = vmatmul.mubr.f32.vlgmr.msra.gmra.mrb[0].mxu0 %v2748_v10 }
  0x90   :  { %2193 = vmatpush3.msra.mxu0 %v2733_v3  ;;  %2171 = vmatprep.mubr.f32.mxu0 %v2759_v15  ;;  %v2695_v3 = vmov 0.0|0.0  }
  0x91   :  { %2428 = vmatprep.subr.bf16.mxu1 %v2695_v3 }
  0x93   :  { %2172 = vmatmul.mubr.f32.gmra.mrb[2].mxu0 %v2761_v16 }
  0x94   :  { %2174 = vmatprep.mubr.f32.mxu0 %v2774_v21 }
  0x97   :  { %2175 = vmatmul.mubr.f32.gmra.mrb[4].mxu0 %v2786_v26 }
  0x98   :  { %2177 = vmatprep.mubr.f32.mxu0 %v2808_v38 }
  0x9b   :  { %2178 = vmatmul.mubr.f32.gmra.mrb[6].mxu0 %v2843_v58 }
  0x9c   :  { %2180 = vmatprep.mubr.f32.mxu0 %v2852_v63 }
  0x9f   :  { %2181 = vmatmul.mubr.f32.gmra.mrb[8].mxu0 %v2862_v5 }
  0xa0   :  { %2183 = vmatprep.mubr.f32.mxu0 %v2864_v6 }
  0xa3   :  { %2184 = vmatmul.mubr.f32.gmra.mrb[10].mxu0 %v2884_v35 }
  0xa4   :  { %2186 = vmatprep.mubr.f32.mxu0 %v2886_v36 }
  0xa7   :  { %2187 = vmatmul.mubr.f32.gmra.mrb[12].mxu0 %v2888_v39 }
  0xa8   :  { %2189 = vmatprep.mubr.f32.mxu0 %v2911_v51 }
  0xab   :  { %2190 = vmatmul.mubr.f32.gmra.mrb[14].mxu0 %v2925_v62 }
  0xac   :  { %2194 = vmatprep.mubr.f32.mxu0 %v2746_v9  ;;  %v2697_v9 = vmov 0.0  }
  0xad   :  { %2250 = vmatprep.mubr.msk.f32.mxu1 %vm2696_vm1, %v2697_v9 }
  0xaf   :  { %2195 = vmatmul.mubr.f32.vlgmr.msra.gmra.mrb[0].mxu0 %v2748_v10  ;;  %v1192_v10 = vld [vmem:[%s3310_s2] sm:$0x1] }
  0xb0   :  { %2197 = vmatprep.mubr.f32.mxu0 %v2759_v15  ;;  %v3057_v19 = vand.u32 4294901760, %v1192_v10 }
  0xb2   :  { %v3062_v28 = vsub.f32 %v1192_v10, %v3057_v19 }
  0xb3   :  { %2198 = vmatmul.mubr.f32.gmra.mrb[2].mxu0 %v2761_v16 }
  0xb4   :  { %2200 = vmatprep.mubr.f32.mxu0 %v2774_v21 }
  0xb7   :  { %2201 = vmatmul.mubr.f32.gmra.mrb[4].mxu0 %v2786_v26 }
  0xb8   :  { %2203 = vmatprep.mubr.f32.mxu0 %v2808_v38 }
  0xbb   :  { %2204 = vmatmul.mubr.f32.gmra.mrb[6].mxu0 %v2843_v58 }
  0xbc   :  { %2206 = vmatprep.mubr.f32.mxu0 %v2852_v63 }
  0xbf   :  { %2207 = vmatmul.mubr.f32.gmra.mrb[8].mxu0 %v2862_v5 }
  0xc0   :  { %2209 = vmatprep.mubr.f32.mxu0 %v2864_v6  ;;  %v3313_v6 = vand.u32 4294901760, %v3062_v28 }
  0xc2   :  { %v3097_v61 = vsub.f32 %v3062_v28, %v3313_v6 }
  0xc3   :  { %2210 = vmatmul.mubr.f32.gmra.mrb[10].mxu0 %v2884_v35 }
  0xc4   :  { %2212 = vmatprep.mubr.f32.mxu0 %v2886_v36 }
  0xc7   :  { %2213 = vmatmul.mubr.f32.gmra.mrb[12].mxu0 %v2888_v39 }
  0xc8   :  { %2215 = vmatprep.mubr.f32.mxu0 %v2911_v51 }
  0xcb   :  { %2216 = vmatmul.mubr.f32.gmra.mrb[14].mxu0 %v2925_v62 }
 0x182   :  { %v2196_v14 = vpop.f32.mrb[0].mxu0 }
 0x183   :  { %v1177_v15 = vmax.f32 %v2196_v14, 0.0  ;;  %v1082_v16 = vpop.f32.mrb[1].mxu0 }
 0x184   :  { %v1176_v20 = vmax.f32 %v1082_v16, 0.0 }
 0x185   :  { %v1199_v21 = vand.u32 4294901760, %v1177_v15 }
 0x186   :  { %v1196_v23 = vand.u32 4294901760, %v1176_v20  ;;  %v2199_v24 = vpop.f32.mrb[2].mxu0 }
 0x187   :  { %v3059_v25 = vsub.f32 %v1177_v15, %v1199_v21  ;;  %v1179_v26 = vmax.f32 %v2199_v24, 0.0  ;;  %v1094_v27 = vpop.f32.mrb[3].mxu0 }
 0x188   :  { %v3064_v29 = vsub.f32 %v1176_v20, %v1196_v23  ;;  %v1178_v32 = vmax.f32 %v1094_v27, 0.0  ;;  %v3066_v33 = vpack.c.bf16 %v1199_v21, %v1196_v23 }
 0x189   :  { %v1296_v34 = vand.u32 4294901760, %v3059_v25  ;;  %v1205_v37 = vand.u32 4294901760, %v1179_v26 }
 0x18a   :  { %v1289_v38 = vand.u32 4294901760, %v3064_v29  ;;  %v2477_v43 = vpack.c.bf16 %v3059_v25, %v3064_v29  ;;  %v1202_v48 = vand.u32 4294901760, %v1178_v32  ;;  %v2202_v57 = vpop.f32.mrb[4].mxu0  ;;  %2430 = vmatpush3.bf16.msra.mxu1 %v3066_v33 }
 0x18b   :  { %v1297_v58 = vsub.f32 %v3059_v25, %v1296_v34  ;;  %v3074_v63 = vsub.f32 %v1179_v26, %v1205_v37  ;;  %v1181_v4 = vmax.f32 %v2202_v57, 0.0  ;;  %v1106_v5 = vpop.f32.mrb[5].mxu0  ;;  %2431 = vmatprep.subr.bf16.mxu1 %v2695_v3 }
 0x18c   :  { %v1290_v7 = vsub.f32 %v3064_v29, %v1289_v38  ;;  %v3079_v18 = vsub.f32 %v1178_v32, %v1202_v48  ;;  %v1180_v22 = vmax.f32 %v1106_v5, 0.0  ;;  %v3081_v30 = vpack.c.bf16 %v1205_v37, %v1202_v48 }
 0x18d   :  { %v1298_v31 = vand.u32 4294901760, %v1297_v58  ;;  %v1310_v35 = vand.u32 4294901760, %v3074_v63  ;;  %v1211_v36 = vand.u32 4294901760, %v1181_v4  ;;  %v3084_v39 = vpack.c.bf16 %v1296_v34, %v1289_v38 }
 0x18e   :  { %v1291_v41 = vand.u32 4294901760, %v1290_v7  ;;  %v1303_v42 = vand.u32 4294901760, %v3079_v18  ;;  %v2480_v46 = vpack.c.bf16 %v3074_v63, %v3079_v18  ;;  %v1208_v47 = vand.u32 4294901760, %v1180_v22  ;;  %v2205_v50 = vpop.f32.mrb[6].mxu0  ;;  %2433 = vmatpush3.bf16.msra.mxu1 %v3081_v30 }
 0x18f   :  { %v1311_v51 = vsub.f32 %v3074_v63, %v1310_v35  ;;  %v3091_v55 = vsub.f32 %v1181_v4, %v1211_v36  ;;  %v1183_v59 = vmax.f32 %v2205_v50, 0.0  ;;  %v1118_v60 = vpop.f32.mrb[7].mxu0  ;;  %2434 = vmatprep.subr.bf16.mxu1 %v2695_v3 }
 0x190   :  { %v1304_v62 = vsub.f32 %v3079_v18, %v1303_v42  ;;  %v3100_v0 = vsub.f32 %v1180_v22, %v1208_v47  ;;  %v1182_v1 = vmax.f32 %v1118_v60, 0.0  ;;  %v3102_v2 = vpack.c.bf16 %v1211_v36, %v1208_v47 }
 0x191   :  { %v1312_v8 = vand.u32 4294901760, %v1311_v51  ;;  %v1324_v11 = vand.u32 4294901760, %v3091_v55  ;;  %v1217_v12 = vand.u32 4294901760, %v1183_v59  ;;  %v3105_v13 = vpack.c.bf16 %v1298_v31, %v1291_v41 }
 0x192   :  { %v1305_v17 = vand.u32 4294901760, %v1304_v62  ;;  %v1317_v40 = vand.u32 4294901760, %v3100_v0  ;;  %v2483_v44 = vpack.c.bf16 %v3091_v55, %v3100_v0  ;;  %v1214_v45 = vand.u32 4294901760, %v1182_v1  ;;  %v2208_v49 = vpop.f32.mrb[8].mxu0  ;;  %2436 = vmatpush3.bf16.msra.mxu1 %v3102_v2 }
 0x193   :  { %v1325_v52 = vsub.f32 %v3091_v55, %v1324_v11  ;;  %v3112_v53 = vsub.f32 %v1183_v59, %v1217_v12  ;;  %v1185_v54 = vmax.f32 %v2208_v49, 0.0  ;;  %v1130_v56 = vpop.f32.mrb[9].mxu0  ;;  %2437 = vmatprep.subr.bf16.mxu1 %v2695_v3  ;;  %v3115_v10 = vpack.c.bf16 %v1310_v35, %v1303_v42 }
 0x194   :  { %v1318_v14 = vsub.f32 %v3100_v0, %v1317_v40  ;;  %v3118_v15 = vsub.f32 %v1182_v1, %v1214_v45  ;;  %v1184_v16 = vmax.f32 %v1130_v56, 0.0  ;;  %v3120_v20 = vpack.c.bf16 %v1217_v12, %v1214_v45 }
 0x195   :  { %v1326_v21 = vand.u32 4294901760, %v1325_v52  ;;  %v1338_v23 = vand.u32 4294901760, %v3112_v53  ;;  %v1223_v24 = vand.u32 4294901760, %v1185_v54  ;;  %v3123_v26 = vpack.c.bf16 %v1312_v8, %v1305_v17 }
 0x196   :  { %v1319_v27 = vand.u32 4294901760, %v1318_v14  ;;  %v1331_v32 = vand.u32 4294901760, %v3118_v15  ;;  %v2486_v34 = vpack.c.bf16 %v3112_v53, %v3118_v15  ;;  %v1220_v37 = vand.u32 4294901760, %v1184_v16  ;;  %v2211_v38 = vpop.f32.mrb[10].mxu0  ;;  %2439 = vmatpush3.bf16.msra.mxu1 %v3120_v20 }
 0x197   :  { %v1339_v48 = vsub.f32 %v3112_v53, %v1338_v23  ;;  %v3130_v57 = vsub.f32 %v1185_v54, %v1223_v24  ;;  %v1187_v58 = vmax.f32 %v2211_v38, 0.0  ;;  %v1142_v4 = vpop.f32.mrb[11].mxu0  ;;  %2440 = vmatprep.subr.bf16.mxu1 %v2695_v3  ;;  %v3133_v5 = vpack.c.bf16 %v1324_v11, %v1317_v40 }
 0x198   :  { %v1332_v7 = vsub.f32 %v3118_v15, %v1331_v32  ;;  %v3136_v22 = vsub.f32 %v1184_v16, %v1220_v37  ;;  %v1186_v31 = vmax.f32 %v1142_v4, 0.0  ;;  %v3138_v35 = vpack.c.bf16 %v1223_v24, %v1220_v37 }
 0x199   :  { %v1340_v36 = vand.u32 4294901760, %v1339_v48  ;;  %v1352_v41 = vand.u32 4294901760, %v3130_v57  ;;  %v1229_v42 = vand.u32 4294901760, %v1187_v58  ;;  %v3141_v47 = vpack.c.bf16 %v1326_v21, %v1319_v27 }
 0x19a   :  { %v1333_v50 = vand.u32 4294901760, %v1332_v7  ;;  %v1345_v51 = vand.u32 4294901760, %v3136_v22  ;;  %v1226_v60 = vand.u32 4294901760, %v1186_v31  ;;  %v2214_v62 = vpop.f32.mrb[12].mxu0  ;;  %2442 = vmatpush3.bf16.msra.mxu1 %v3138_v35  ;;  %v3151_v17 = vpack.c.bf16 %v1338_v23, %v1331_v32 }
 0x19b   :  { %v1353_v1 = vsub.f32 %v3130_v57, %v1352_v41  ;;  %v3148_v8 = vsub.f32 %v1187_v58, %v1229_v42  ;;  %v1189_v11 = vmax.f32 %v2214_v62, 0.0  ;;  %v1154_v12 = vpop.f32.mrb[13].mxu0  ;;  %2443 = vmatprep.subr.bf16.mxu1 %v2695_v3  ;;  %v3314_v25 = vpack.c.bf16 %v3130_v57, %v3136_v22 }
 0x19c   :  { %v1346_v40 = vsub.f32 %v3136_v22, %v1345_v51  ;;  %v3154_v45 = vsub.f32 %v1186_v31, %v1226_v60  ;;  %v1188_v49 = vmax.f32 %v1154_v12, 0.0  ;;  %v3156_v52 = vpack.c.bf16 %v1229_v42, %v1226_v60 }
 0x19d   :  { %v1354_v54 = vand.u32 4294901760, %v1353_v1  ;;  %v1366_v56 = vand.u32 4294901760, %v3148_v8  ;;  %v1235_v14 = vand.u32 4294901760, %v1189_v11  ;;  %v2462_v16 = vpack.c.bf16 %v1340_v36, %v1333_v50 }
 0x19e   :  { %v1347_v21 = vand.u32 4294901760, %v1346_v40  ;;  %v1359_v24 = vand.u32 4294901760, %v3154_v45  ;;  %v1232_v23 = vand.u32 4294901760, %v1188_v49  ;;  %v2217_v32 = vpop.f32.mrb[14].mxu0  ;;  %2445 = vmatpush3.bf16.msra.mxu1 %v3156_v52  ;;  %v3167_v4 = vpack.c.bf16 %v1352_v41, %v1345_v51 }
 0x19f   :  { %v1367_v37 = vsub.f32 %v3148_v8, %v1366_v56  ;;  %v3164_v38 = vsub.f32 %v1189_v11, %v1235_v14  ;;  %v1191_v48 = vmax.f32 %v2217_v32, 0.0  ;;  %v1166_v58 = vpop.f32.mrb[15].mxu0  ;;  %2446 = vmatprep.subr.bf16.mxu1 %v2695_v3  ;;  %v3315_v29 = vpack.c.bf16 %v3148_v8, %v3154_v45 }
 0x1a0   :  { %v1360_v7 = vsub.f32 %v3154_v45, %v1359_v24  ;;  %v3170_v31 = vsub.f32 %v1188_v49, %v1232_v23  ;;  %v1190_v36 = vmax.f32 %v1166_v58, 0.0  ;;  %v3172_v42 = vpack.c.bf16 %v1235_v14, %v1232_v23 }
 0x1a1   :  { %v1368_v50 = vand.u32 4294901760, %v1367_v37  ;;  %v1380_v60 = vand.u32 4294901760, %v3164_v38  ;;  %v1241_v62 = vand.u32 4294901760, %v1191_v48  ;;  %v2465_v1 = vpack.c.bf16 %v1354_v54, %v1347_v21 }
 0x1a2   :  { %v1361_v11 = vand.u32 4294901760, %v1360_v7  ;;  %v1373_v12 = vand.u32 4294901760, %v3170_v31  ;;  %v2495_v40 = vpack.c.bf16 %v3164_v38, %v3170_v31  ;;  %v1238_v41 = vand.u32 4294901760, %v1190_v36  ;;  %2448 = vmatpush3.bf16.msra.mxu1 %v3172_v42 }
 0x1a3   :  { %v1381_v51 = vsub.f32 %v3164_v38, %v1380_v60  ;;  %v1393_v49 = vsub.f32 %v1191_v48, %v1241_v62  ;;  %2449 = vmatprep.subr.bf16.mxu1 %v2695_v3  ;;  %v3181_v14 = vpack.c.bf16 %v1366_v56, %v1359_v24  ;;  %v1280_v7 = vand.u32 4294901760, %v3097_v61 }
 0x1a4   :  { %v1374_v23 = vsub.f32 %v3170_v31, %v1373_v12  ;;  %v3184_v32 = vpack.c.bf16 %v1241_v62, %v1238_v41  ;;  %v1386_v54 = vsub.f32 %v1190_v36, %v1238_v41  ;;  %v2468_v21 = vpack.c.bf16 %v1368_v50, %v1361_v11 }
 0x1a5   :  { %v1382_v37 = vand.u32 4294901760, %v1381_v51  ;;  %v1394_v58 = vand.u32 4294901760, %v1393_v49  ;;  %v3187_v6 = vpack.c.bf16 %v1380_v60, %v1373_v12 }
 0x1a6   :  { %v1375_v27 = vand.u32 4294901760, %v1374_v23  ;;  %v1387_v59 = vand.u32 4294901760, %v1386_v54  ;;  %v2498_v38 = vpack.c.bf16 %v1393_v49, %v1386_v54  ;;  %2451 = vmatpush3.bf16.msra.mxu1 %v3184_v32 }
 0x1a7   :  { %v1395_v48 = vsub.f32 %v1393_v49, %v1394_v58  ;;  %2452 = vmatprep.subr.bf16.mxu1 %v2695_v3 }
 0x1a8   :  { %v1388_v56 = vsub.f32 %v1386_v54, %v1387_v59  ;;  %v2471_v24 = vpack.c.bf16 %v1382_v37, %v1375_v27  ;;  %v3191_v31 = vpack.c.bf16 %v1394_v58, %v1387_v59 }
 0x1a9   :  { %v1396_v36 = vand.u32 4294901760, %v1395_v48  ;;  %2251 = vmatmul.mubr.f32.vlgmr.msra.gmra.mrb[0].mxu1 %v1280_v7 }
 0x1aa   :  { %v1389_v50 = vand.u32 4294901760, %v1388_v56  ;;  %2454 = vmatpush3.bf16.msra.mxu1 %v3105_v13  ;;  %2285 = vmatprep.mubr.msk.f32.mxu1 %vm2696_vm1, %v2697_v9 }
 0x1ab   :  { %2455 = vmatprep.subr.bf16.mxu1 %v2695_v3 }
 0x1ac   :  { %v2474_v61 = vpack.c.bf16 %v1396_v36, %v1389_v50 }
 0x1ae   :  { %2457 = vmatpush3.bf16.msra.mxu1 %v3123_v26 }
 0x1af   :  { %2458 = vmatprep.subr.bf16.mxu1 %v2695_v3 }
 0x1b2   :  { %2460 = vmatpush3.bf16.msra.mxu1 %v3141_v47 }
 0x1b3   :  { %2461 = vmatprep.subr.bf16.mxu1 %v2695_v3 }
 0x1b6   :  { %2463 = vmatpush3.bf16.msra.mxu1 %v2462_v16 }
 0x1b7   :  { %2464 = vmatprep.subr.bf16.mxu1 %v2695_v3 }
 0x1ba   :  { %2466 = vmatpush3.bf16.msra.mxu1 %v2465_v1 }
 0x1bb   :  { %2467 = vmatprep.subr.bf16.mxu1 %v2695_v3 }
 0x1be   :  { %2469 = vmatpush3.bf16.msra.mxu1 %v2468_v21 }
 0x1bf   :  { %2470 = vmatprep.subr.bf16.mxu1 %v2695_v3 }
 0x1c2   :  { %2472 = vmatpush3.bf16.msra.mxu1 %v2471_v24 }
 0x1c3   :  { %2473 = vmatprep.subr.bf16.mxu1 %v2695_v3 }
 0x1c6   :  { %2475 = vmatpush3.bf16.msra.mxu1 %v2474_v61 }
 0x1c7   :  { %2476 = vmatprep.subr.bf16.mxu1 %v2695_v3 }
 0x1c9   :  { %2286 = vmatmul.mubr.f32.vlgmr.msra.gmra.mrb[0].mxu1 %v3057_v19 }
 0x1ca   :  { %2478 = vmatpush3.bf16.msra.mxu1 %v2477_v43  ;;  %2320 = vmatprep.mubr.msk.f32.mxu1 %vm2696_vm1, %v2697_v9  ;;  %v3316_v43 = vand.u32 4294901760, %v3062_v28 }
 0x1cb   :  { %2479 = vmatprep.subr.bf16.mxu1 %v2695_v3 }
 0x1ce   :  { %2481 = vmatpush3.bf16.msra.mxu1 %v2480_v46 }
 0x1cf   :  { %2482 = vmatprep.subr.bf16.mxu1 %v2695_v3 }
 0x1d2   :  { %2484 = vmatpush3.bf16.msra.mxu1 %v2483_v44 }
 0x1d3   :  { %2485 = vmatprep.subr.bf16.mxu1 %v2695_v3 }
 0x1d6   :  { %2487 = vmatpush3.bf16.msra.mxu1 %v2486_v34 }
 0x1d7   :  { %2488 = vmatprep.subr.bf16.mxu1 %v2695_v3 }
 0x1da   :  { %2490 = vmatpush3.bf16.msra.mxu1 %v3314_v25 }
 0x1db   :  { %2491 = vmatprep.subr.bf16.mxu1 %v2695_v3 }
 0x1de   :  { %2493 = vmatpush3.bf16.msra.mxu1 %v3315_v29 }
 0x1df   :  { %2494 = vmatprep.subr.bf16.mxu1 %v2695_v3 }
 0x1e2   :  { %2496 = vmatpush3.bf16.msra.mxu1 %v2495_v40 }
 0x1e3   :  { %2497 = vmatprep.subr.bf16.mxu1 %v2695_v3 }
 0x1e6   :  { %2499 = vmatpush3.bf16.msra.mxu1 %v2498_v38 }
 0x1e7   :  { %2500 = vmatprep.subr.bf16.mxu1 %v2695_v3 }
 0x1e9   :  { %2321 = vmatmul.mubr.f32.vlgmr.msra.gmra.mrb[0].mxu1 %v3062_v28 }
 0x1ea   :  { %2502 = vmatpush3.bf16.msra.mxu1 %v3066_v33  ;;  %2355 = vmatprep.mubr.msk.f32.mxu1 %vm2696_vm1, %v2697_v9 }
 0x1eb   :  { %2503 = vmatprep.subr.bf16.mxu1 %v2695_v3 }
 0x1ee   :  { %2505 = vmatpush3.bf16.msra.mxu1 %v3081_v30 }
 0x1ef   :  { %2506 = vmatprep.subr.bf16.mxu1 %v2695_v3 }
 0x1f2   :  { %2508 = vmatpush3.bf16.msra.mxu1 %v3102_v2 }
 0x1f3   :  { %2509 = vmatprep.subr.bf16.mxu1 %v2695_v3 }
 0x1f6   :  { %2511 = vmatpush3.bf16.msra.mxu1 %v3120_v20 }
 0x1f7   :  { %2512 = vmatprep.subr.bf16.mxu1 %v2695_v3 }
 0x1fa   :  { %2514 = vmatpush3.bf16.msra.mxu1 %v3138_v35 }
 0x1fb   :  { %2515 = vmatprep.subr.bf16.mxu1 %v2695_v3 }
 0x1fe   :  { %2517 = vmatpush3.bf16.msra.mxu1 %v3156_v52 }
 0x1ff   :  { %2518 = vmatprep.subr.bf16.mxu1 %v2695_v3 }
 0x202   :  { %2520 = vmatpush3.bf16.msra.mxu1 %v3172_v42 }
 0x203   :  { %2521 = vmatprep.subr.bf16.mxu1 %v2695_v3 }
 0x206   :  { %2523 = vmatpush3.bf16.msra.mxu1 %v3184_v32 }
 0x207   :  { %2524 = vmatprep.subr.bf16.mxu1 %v2695_v3 }
 0x209   :  { %2356 = vmatmul.mubr.f32.vlgmr.msra.gmra.mrb[0].mxu1 %v3316_v43 }
 0x20a   :  { %2526 = vmatpush3.bf16.msra.mxu1 %v3084_v39  ;;  %2390 = vmatprep.mubr.msk.f32.mxu1 %vm2696_vm1, %v2697_v9 }
 0x20b   :  { %2527 = vmatprep.subr.bf16.mxu1 %v2695_v3 }
 0x20e   :  { %2529 = vmatpush3.bf16.msra.mxu1 %v3115_v10 }
 0x20f   :  { %2530 = vmatprep.subr.bf16.mxu1 %v2695_v3 }
 0x212   :  { %2532 = vmatpush3.bf16.msra.mxu1 %v3133_v5 }
 0x213   :  { %2533 = vmatprep.subr.bf16.mxu1 %v2695_v3 }
 0x216   :  { %2535 = vmatpush3.bf16.msra.mxu1 %v3151_v17 }
 0x217   :  { %2536 = vmatprep.subr.bf16.mxu1 %v2695_v3 }
 0x21a   :  { %2538 = vmatpush3.bf16.msra.mxu1 %v3167_v4 }
 0x21b   :  { %2539 = vmatprep.subr.bf16.mxu1 %v2695_v3 }
 0x21e   :  { %2541 = vmatpush3.bf16.msra.mxu1 %v3181_v14 }
 0x21f   :  { %2542 = vmatprep.subr.bf16.mxu1 %v2695_v3 }
 0x222   :  { %2544 = vmatpush3.bf16.msra.mxu1 %v3187_v6 }
 0x223   :  { %2545 = vmatprep.subr.bf16.mxu1 %v2695_v3 }
 0x226   :  { %2547 = vmatpush3.bf16.msra.mxu1 %v3191_v31 }
 0x227   :  { %2548 = vmatprep.subr.bf16.mxu1 %v2695_v3 }
 0x229   :  { %2391 = vmatmul.mubr.f32.vlgmr.msra.gmra.mrb[0].mxu1 %v3057_v19 }
 0x22a   :  { %2550 = vmatpush3.bf16.msra.mxu1 %v3066_v33  ;;  %2425 = vmatprep.mubr.msk.f32.mxu1 %vm2696_vm1, %v2697_v9  ;;  %v1194_v9 = vstv %s3311_s3 }
 0x22b   :  { %2551 = vmatprep.subr.bf16.mxu1 %v2695_v3 }
 0x22e   :  { %2553 = vmatpush3.bf16.msra.mxu1 %v3081_v30 }
 0x22f   :  { %2554 = vmatprep.subr.bf16.mxu1 %v2695_v3 }
 0x232   :  { %2556 = vmatpush3.bf16.msra.mxu1 %v3102_v2 }
 0x233   :  { %2557 = vmatprep.subr.bf16.mxu1 %v2695_v3 }
 0x236   :  { %2559 = vmatpush3.bf16.msra.mxu1 %v3120_v20 }
 0x237   :  { %2560 = vmatprep.subr.bf16.mxu1 %v2695_v3 }
 0x23a   :  { %2562 = vmatpush3.bf16.msra.mxu1 %v3138_v35 }
 0x23b   :  { %2563 = vmatprep.subr.bf16.mxu1 %v2695_v3 }
 0x23e   :  { %2565 = vmatpush3.bf16.msra.mxu1 %v3156_v52 }
 0x23f   :  { %2566 = vmatprep.subr.bf16.mxu1 %v2695_v3 }
 0x242   :  { %2568 = vmatpush3.bf16.msra.mxu1 %v3172_v42 }
 0x243   :  { %2569 = vmatprep.subr.bf16.mxu1 %v2695_v3 }
 0x246   :  { %2571 = vmatpush3.bf16.msra.mxu1 %v3184_v32 }
 0x249   :  { %2426 = vmatmul.mubr.f32.vlgmr.msra.gmra.mrb[0].mxu1 %v3057_v19 }
 0x31c   :  { %v1832_v28 = vpop.f32.mrb[0].mxu1 }
 0x31d   :  { %v2572_v33 = vadd.f32 %v1832_v28, %v1194_v9  ;;  %v2427_v63 = vpop.f32.mrb[1].mxu1 }
 0x31f   :  { %v1857_v6 = vmul.f32 -1.442695, %v2572_v33 }
 0x321   :  { %2667 = vpow2.f32 %v1857_v6 }
 0x32b   :  { %v2668_v18 = vpop.eup %2667 }
 0x32c   :  { %v1839_v30 = vadd.f32 1.0, %v2668_v18 }
 0x32e   :  { %2669 = vrcp.f32 %v1839_v30 }
 0x338   :  { %v2670_v3 = vpop.eup %2669 }
 0x339   :  { %1842 = vst [vmem:[#allocation3] sm:$0x1] %v2670_v3 }
 0x33a   :  { %2682 = shalt.err (!%p2679_p4)
}
 0x33b   :  { %s2683_s28 = scalar_lea.hbm %s3312_s4, 16 }
 0x33c   :  { %p2684_p5 = scmp.ne.s32.totalorder %s3312_s4, %s2683_s28  ;;  %p2687_p6 = scmp.lt.u32.totalorder %s2683_s28, %s3312_s4 }
 0x33e   :  { %p2689_p7 = pnand %p2687_p6, %p2684_p5 }
 0x340   :  { %2692 = shalt.err (!%p2689_p7)
}
 0x341   :  { %1852 = dma.vmem_to_hbm [thread:$0]  %s1850_s24, 16, %s3312_s4, [#allocation4]  }
 0x342   :  { %2693 = dma.done.wait [#allocation4], 16  }
 0x343   :  { %2694 = vsyncadd [#allocation4], 4294967280 }
 0x344   :  { %1856 = vsyncpa [#allocation4], 1 }

</bundles_post_ra>
